<compile_context>
chip_gen: v5e
topology: v5e:2x2
jax: 0.10.0
libtpu: 0.0.40
codegen_flags: <defaults>
</compile_context>

<pallas_src>
import numpy as np
import jax
import jax.numpy as jnp
from jax.experimental import pallas as pl
from jax.experimental.pallas import tpu as pltpu


def ori_kernel(nf_ref, w1cat_ref, b1_ref, w2_ref, b2_ref, w3_ref, b3_ref,
               out_ref):
    # nf_ref   : (1, D, N, H) f32   raw node features for this batch element
    # w1cat_ref: (H, 3*4H)   bf16   [W1_T | W1_X | W1_Y] fused first layer
    # b1_ref   : (1, 4H)     f32
    # w2_ref   : (4H, 4H)    bf16
    # b2_ref   : (1, 4H)     f32
    # w3_ref   : (1, 4H)     bf16   affine-scaled last-layer weights (row)
    # b3_ref   : (1, 1) SMEM f32    affine-folded last-layer bias (scalar)
    # out_ref  : (1, 1, N^3) f32    lane-dense sigmoid output
    N = nf_ref.shape[2]
    H4 = b1_ref.shape[1]
    M = N * N * N

    # Dataset-axis max fused into the kernel: elementwise VPU max across the
    # D feature slabs (no extra launch, no HBM intermediate).
    feat = jnp.max(nf_ref[0], axis=0)                               # (N, H) f32

    # One MXU push for all three projections (T / X / Y roles of every node),
    # bf16 inputs, f32 accumulation.
    proj = jnp.dot(feat.astype(jnp.bfloat16), w1cat_ref[...],
                   preferred_element_type=jnp.float32)              # (N, 3*4H)
    pT = proj[:, :H4]
    pX = proj[:, H4:2 * H4]
    pY = proj[:, 2 * H4:]

    # (x, y) plane computed once, flattened to rows r_xy = x*N + y.
    base = pX[:, None, :] + pY[None, :, :] + b1_ref[...]            # (N, N, 4H)
    base_f = base.reshape(N * N, H4)                                # leading collapse (free)

    # Full cube rows r = t*N*N + x*N + y, built directly in flat layout.
    h1 = jax.nn.relu(pT[:, None, :] + base_f[None, :, :])           # (N, N*N, 4H)
    h1f = h1.reshape(M, H4).astype(jnp.bfloat16)                    # leading collapse (free)

    # Second layer: one large (M, 4H) x (4H, 4H) GEMM, bf16 in / f32 acc.
    h2f = jax.nn.relu(
        jnp.dot(h1f, w2_ref[...], preferred_element_type=jnp.float32)
        + b2_ref[...])                                              # (M, 4H) f32

    # Final Linear(4H -> 1) with the scalar affine folded in, as a
    # transposed-RHS MXU dot: (1, 4H) . (M, 4H)^T -> (1, M)  (lane-dense).
    logit = jax.lax.dot_general(
        w3_ref[...], h2f.astype(jnp.bfloat16),
        dimension_numbers=(((1,), (1,)), ((), ())),
        preferred_element_type=jnp.float32)                         # (1, M)

    out_ref[0, :, :] = jax.nn.sigmoid(logit + b3_ref[0, 0])


def ori_nodewise_forward(node_feature, params):
    B, D, N, H = node_feature.shape
    M = N * N * N

    w1 = params["w1"].astype(jnp.float32)                           # (3H, 4H)
    H4 = w1.shape[1]
    # Fuse the split first layer into one (H, 3*4H) RHS: [W1_T | W1_X | W1_Y].
    w1cat = jnp.concatenate([w1[:H], w1[H:2 * H], w1[2 * H:]],
                            axis=1).astype(jnp.bfloat16)
    b1 = params["b1"].reshape(1, H4).astype(jnp.float32)
    w2 = params["w2"].astype(jnp.bfloat16)                          # (4H, 4H)
    b2 = params["b2"].reshape(1, H4).astype(jnp.float32)

    # Fold the scalar affine into the last linear:
    #   a*(x@w3 + b3) + c = x@(a*w3) + (a*b3 + c)
    a = params["affine_w"]
    c = params["affine_b"]
    w3row = (a * params["w3"]).reshape(1, H4).astype(jnp.bfloat16)  # (1, 4H)
    b3f = jnp.asarray(a * params["b3"] + c, jnp.float32).reshape(1, 1)

    out = pl.pallas_call(
        ori_kernel,
        out_shape=jax.ShapeDtypeStruct((B, 1, M), jnp.float32),
        grid_spec=pltpu.PrefetchScalarGridSpec(
            num_scalar_prefetch=0,
            grid=(B,),
            in_specs=[
                pl.BlockSpec((1, D, N, H), lambda b: (b, 0, 0, 0)),   # node_feature
                pl.BlockSpec((H, 3 * H4), lambda b: (0, 0)),          # w1cat
                pl.BlockSpec((1, H4), lambda b: (0, 0)),              # b1
                pl.BlockSpec((H4, H4), lambda b: (0, 0)),             # w2
                pl.BlockSpec((1, H4), lambda b: (0, 0)),              # b2
                pl.BlockSpec((1, H4), lambda b: (0, 0)),              # w3 row
                pl.BlockSpec(memory_space=pltpu.MemorySpace.SMEM),    # b3 scalar
            ],
            out_specs=pl.BlockSpec((1, 1, M), lambda b: (b, 0, 0)),
        ),
        compiler_params=pltpu.CompilerParams(
            dimension_semantics=("parallel",)),                       # v7x: 1 batch / TC
    )(node_feature.astype(jnp.float32), w1cat, b1, w2, b2, w3row, b3f)

    # rows were flattened as r = t*N*N + x*N + y; .squeeze() mirrors torch.
    return jnp.squeeze(out.reshape(B, N, N, N))


def reference_forward(node_feature, params):
    """Pure-JAX f32 reference that mirrors the torch code literally."""
    f = jnp.max(node_feature, axis=-3)                              # (B, N, H)
    B, N, H = f.shape
    fT = jnp.broadcast_to(f[:, :, None, None, :], (B, N, N, N, H))
    fX = jnp.broadcast_to(f[:, None, :, None, :], (B, N, N, N, H))
    fY = jnp.broadcast_to(f[:, None, None, :, :], (B, N, N, N, H))
    cat = jnp.concatenate([fT, fX, fY], axis=-1)                    # (B, N, N, N, 3H)
    h1 = jax.nn.relu(cat @ params["w1"] + params["b1"])
    h2 = jax.nn.relu(h1 @ params["w2"] + params["b2"])
    logit = h2 @ params["w3"] + params["b3"]                        # (..., 1)
    out = jax.nn.sigmoid(params["affine_w"] * logit + params["affine_b"])
    return jnp.squeeze(out)


def make_params(hidden_dim, key):
    H = hidden_dim
    ks = jax.random.split(key, 6)
    scale = 0.1
    return {
        "w1": scale * jax.random.normal(ks[0], (3 * H, 4 * H), jnp.float32),
        "b1": scale * jax.random.normal(ks[1], (4 * H,), jnp.float32),
        "w2": scale * jax.random.normal(ks[2], (4 * H, 4 * H), jnp.float32),
        "b2": scale * jax.random.normal(ks[3], (4 * H,), jnp.float32),
        "w3": scale * jax.random.normal(ks[4], (4 * H, 1), jnp.float32),
        "b3": scale * jax.random.normal(ks[5], (1,), jnp.float32),
        "affine_w": 1.5,
        "affine_b": -0.25,
    }


if __name__ == "__main__":
    B, D, N, hidden_dim = 2, 4, 8, 32   # batch, dataset_size, num_of_nodes, hidden_dim
    key = jax.random.PRNGKey(0)
    k_in, k_par = jax.random.split(key)
    node_feature = jax.random.normal(k_in, (B, D, N, hidden_dim), jnp.float32)
    params = make_params(hidden_dim, k_par)

    fwd = jax.jit(ori_nodewise_forward)
    out = jax.block_until_ready(fwd(node_feature, params))
    ref = jax.block_until_ready(reference_forward(node_feature, params))

    assert out.shape == ref.shape, (out.shape, ref.shape)
    # bf16 MXU inputs with f32 accumulation: tolerance relaxed per the review.
    np.testing.assert_allclose(np.asarray(out), np.asarray(ref),
                               atol=2e-2, rtol=2e-2)
    print("KERNEL_OK")
</pallas_src>

<mosaic_0001>
module attributes {stable_mosaic.version = 11 : i64} {
  func.func @ori_kernel(%arg0: i32, %arg1: memref<1x4x8x32xf32, #tpu.memory_space<vmem>>, %arg2: memref<32x384xbf16, #tpu.memory_space<vmem>>, %arg3: memref<1x128xf32, #tpu.memory_space<vmem>>, %arg4: memref<128x128xbf16, #tpu.memory_space<vmem>>, %arg5: memref<1x128xf32, #tpu.memory_space<vmem>>, %arg6: memref<1x128xbf16, #tpu.memory_space<vmem>>, %arg7: memref<1x1xf32, #tpu.memory_space<smem>>, %arg8: memref<1x1x512xf32, #tpu.memory_space<vmem>>) attributes {dimension_semantics = [#tpu.dimension_semantics<parallel>], iteration_bounds = array<i64: 2>, scalar_prefetch = 0 : i64, scratch_operands = 0 : i64, tpu.core_type = #tpu.core_type<tc>, window_params = [{transform_indices = @transform_0, window_bounds = array<i64: 1, 4, 8, 32>}, {pipeline_mode = #tpu.pipeline_mode<synchronous>, transform_indices = @transform_1, window_bounds = array<i64: 32, 384>}, {pipeline_mode = #tpu.pipeline_mode<synchronous>, transform_indices = @transform_2, window_bounds = array<i64: 1, 128>}, {pipeline_mode = #tpu.pipeline_mode<synchronous>, transform_indices = @transform_3, window_bounds = array<i64: 128, 128>}, {pipeline_mode = #tpu.pipeline_mode<synchronous>, transform_indices = @transform_4, window_bounds = array<i64: 1, 128>}, {pipeline_mode = #tpu.pipeline_mode<synchronous>, transform_indices = @transform_5, window_bounds = array<i64: 1, 128>}, {transform_indices = @transform_6, window_bounds = array<i64: 1, 1>}, {transform_indices = @transform_7, window_bounds = array<i64: 1, 1, 512>}]} {
    %c0 = arith.constant 0 : index
    %c0_0 = arith.constant 0 : index
    %c0_1 = arith.constant 0 : index
    %c0_2 = arith.constant 0 : index
    %0 = vector.load %arg1[%c0, %c0_0, %c0_1, %c0_2] : memref<1x4x8x32xf32, #tpu.memory_space<vmem>>, vector<1x4x8x32xf32>
    %1 = vector.shape_cast %0 : vector<1x4x8x32xf32> to vector<4x8x32xf32>
    %cst = arith.constant dense<0xFF800000> : vector<8x32xf32>
    %2 = vector.multi_reduction <maximumf>, %1, %cst [0] : vector<4x8x32xf32> to vector<8x32xf32>
    %3 = arith.truncf %2 : vector<8x32xf32> to vector<8x32xbf16>
    %c0_3 = arith.constant 0 : index
    %c0_4 = arith.constant 0 : index
    %4 = vector.load %arg2[%c0_3, %c0_4] : memref<32x384xbf16, #tpu.memory_space<vmem>>, vector<32x384xbf16>
    %cst_5 = arith.constant dense<0.000000e+00> : vector<8x384xf32>
    %5 = tpu.matmul %3, %4, %cst_5 {dimension_numbers = #tpu.dot_dimension_numbers<[1], [0], [0], [1], [0, 0, 1, 1], [], []>} : vector<8x32xbf16>, vector<32x384xbf16>, vector<8x384xf32> -> vector<8x384xf32>
    %6 = vector.extract_strided_slice %5 {offsets = [0, 0], sizes = [8, 128], strides = [1, 1]} : vector<8x384xf32> to vector<8x128xf32>
    %7 = vector.extract_strided_slice %5 {offsets = [0, 128], sizes = [8, 128], strides = [1, 1]} : vector<8x384xf32> to vector<8x128xf32>
    %8 = vector.extract_strided_slice %5 {offsets = [0, 256], sizes = [8, 128], strides = [1, 1]} : vector<8x384xf32> to vector<8x128xf32>
    %9 = vector.shape_cast %7 : vector<8x128xf32> to vector<8x1x128xf32>
    %10 = vector.shape_cast %8 : vector<8x128xf32> to vector<1x8x128xf32>
    %11 = vector.broadcast %9 : vector<8x1x128xf32> to vector<8x8x128xf32>
    %12 = vector.broadcast %10 : vector<1x8x128xf32> to vector<8x8x128xf32>
    %13 = arith.addf %11, %12 : vector<8x8x128xf32>
    %c0_6 = arith.constant 0 : index
    %c0_7 = arith.constant 0 : index
    %14 = vector.load %arg3[%c0_6, %c0_7] : memref<1x128xf32, #tpu.memory_space<vmem>>, vector<1x128xf32>
    %15 = vector.shape_cast %14 : vector<1x128xf32> to vector<1x1x128xf32>
    %16 = vector.broadcast %15 : vector<1x1x128xf32> to vector<8x8x128xf32>
    %17 = arith.addf %13, %16 : vector<8x8x128xf32>
    %18 = vector.shape_cast %17 : vector<8x8x128xf32> to vector<64x128xf32>
    %19 = vector.shape_cast %6 : vector<8x128xf32> to vector<8x1x128xf32>
    %20 = vector.shape_cast %18 : vector<64x128xf32> to vector<1x64x128xf32>
    %21 = vector.broadcast %19 : vector<8x1x128xf32> to vector<8x64x128xf32>
    %22 = vector.broadcast %20 : vector<1x64x128xf32> to vector<8x64x128xf32>
    %23 = arith.addf %21, %22 : vector<8x64x128xf32>
    %cst_8 = arith.constant 0.000000e+00 : f32
    %24 = vector.broadcast %cst_8 : f32 to vector<8x64x128xf32>
    %25 = arith.maximumf %23, %24 : vector<8x64x128xf32>
    %26 = vector.shape_cast %25 : vector<8x64x128xf32> to vector<512x128xf32>
    %27 = arith.truncf %26 : vector<512x128xf32> to vector<512x128xbf16>
    %c0_9 = arith.constant 0 : index
    %c0_10 = arith.constant 0 : index
    %28 = vector.load %arg4[%c0_9, %c0_10] : memref<128x128xbf16, #tpu.memory_space<vmem>>, vector<128x128xbf16>
    %cst_11 = arith.constant dense<0.000000e+00> : vector<512x128xf32>
    %29 = tpu.matmul %27, %28, %cst_11 {dimension_numbers = #tpu.dot_dimension_numbers<[1], [0], [0], [1], [0, 0, 1, 1], [], []>} : vector<512x128xbf16>, vector<128x128xbf16>, vector<512x128xf32> -> vector<512x128xf32>
    %c0_12 = arith.constant 0 : index
    %c0_13 = arith.constant 0 : index
    %30 = vector.load %arg5[%c0_12, %c0_13] : memref<1x128xf32, #tpu.memory_space<vmem>>, vector<1x128xf32>
    %31 = vector.broadcast %30 : vector<1x128xf32> to vector<512x128xf32>
    %32 = arith.addf %29, %31 : vector<512x128xf32>
    %cst_14 = arith.constant 0.000000e+00 : f32
    %33 = vector.broadcast %cst_14 : f32 to vector<512x128xf32>
    %34 = arith.maximumf %32, %33 : vector<512x128xf32>
    %c0_15 = arith.constant 0 : index
    %c0_16 = arith.constant 0 : index
    %35 = vector.load %arg6[%c0_15, %c0_16] : memref<1x128xbf16, #tpu.memory_space<vmem>>, vector<1x128xbf16>
    %36 = arith.truncf %34 : vector<512x128xf32> to vector<512x128xbf16>
    %cst_17 = arith.constant dense<0.000000e+00> : vector<1x512xf32>
    %37 = tpu.matmul %35, %36, %cst_17 {dimension_numbers = #tpu.dot_dimension_numbers<[1], [1], [0], [0], [0, 0, 1, 0], [], []>} : vector<1x128xbf16>, vector<512x128xbf16>, vector<1x512xf32> -> vector<1x512xf32>
    %c0_18 = arith.constant 0 : index
    %c0_19 = arith.constant 0 : index
    %38 = memref.load %arg7[%c0_18, %c0_19] : memref<1x1xf32, #tpu.memory_space<smem>>
    %39 = vector.broadcast %38 : f32 to vector<1x512xf32>
    %40 = arith.addf %37, %39 : vector<1x512xf32>
    %41 = arith.negf %40 : vector<1x512xf32>
    %42 = math.exp %41 : vector<1x512xf32>
    %cst_20 = arith.constant 1.000000e+00 : f32
    %43 = vector.broadcast %cst_20 : f32 to vector<1x512xf32>
    %44 = arith.addf %43, %42 : vector<1x512xf32>
    %45 = arith.divf %43, %44 : vector<1x512xf32>
    %c0_21 = arith.constant 0 : index
    %c0_22 = arith.constant 0 : index
    %c0_23 = arith.constant 0 : index
    %46 = vector.load %arg8[%c0_21, %c0_22, %c0_23] : memref<1x1x512xf32, #tpu.memory_space<vmem>>, vector<1x1x512xf32>
    %47 = vector.shape_cast %46 : vector<1x1x512xf32> to vector<1x512xf32>
    %48 = vector.shape_cast %45 : vector<1x512xf32> to vector<1x1x512xf32>
    tpu.vector_store %arg8[%c0_21, %c0_22, %c0_23], %48 {strides = array<i32>} : memref<1x1x512xf32, #tpu.memory_space<vmem>>, vector<1x1x512xf32>,
    return
  }
  func.func @transform_0(%arg0: i32) -> (i32, i32, i32, i32) {
    %c0_i32 = arith.constant 0 : i32
    %c0_i32_0 = arith.constant 0 : i32
    %c0_i32_1 = arith.constant 0 : i32
    %c0_i32_2 = arith.constant 0 : i32
    return %arg0, %c0_i32, %c0_i32_0, %c0_i32_1 : i32, i32, i32, i32
  }
  func.func @transform_1(%arg0: i32) -> (i32, i32) {
    %c0_i32 = arith.constant 0 : i32
    %c0_i32_0 = arith.constant 0 : i32
    %c0_i32_1 = arith.constant 0 : i32
    return %c0_i32, %c0_i32_0 : i32, i32
  }
  func.func @transform_2(%arg0: i32) -> (i32, i32) {
    %c0_i32 = arith.constant 0 : i32
    %c0_i32_0 = arith.constant 0 : i32
    %c0_i32_1 = arith.constant 0 : i32
    return %c0_i32, %c0_i32_0 : i32, i32
  }
  func.func @transform_3(%arg0: i32) -> (i32, i32) {
    %c0_i32 = arith.constant 0 : i32
    %c0_i32_0 = arith.constant 0 : i32
    %c0_i32_1 = arith.constant 0 : i32
    return %c0_i32, %c0_i32_0 : i32, i32
  }
  func.func @transform_4(%arg0: i32) -> (i32, i32) {
    %c0_i32 = arith.constant 0 : i32
    %c0_i32_0 = arith.constant 0 : i32
    %c0_i32_1 = arith.constant 0 : i32
    return %c0_i32, %c0_i32_0 : i32, i32
  }
  func.func @transform_5(%arg0: i32) -> (i32, i32) {
    %c0_i32 = arith.constant 0 : i32
    %c0_i32_0 = arith.constant 0 : i32
    %c0_i32_1 = arith.constant 0 : i32
    return %c0_i32, %c0_i32_0 : i32, i32
  }
  func.func @transform_6(%arg0: i32) -> (i32, i32) {
    %c0_i32 = arith.constant 0 : i32
    %c0_i32_0 = arith.constant 0 : i32
    %c0_i32_1 = arith.constant 0 : i32
    return %c0_i32, %c0_i32_0 : i32, i32
  }
  func.func @transform_7(%arg0: i32) -> (i32, i32, i32) {
    %c0_i32 = arith.constant 0 : i32
    %c0_i32_0 = arith.constant 0 : i32
    %c0_i32_1 = arith.constant 0 : i32
    return %arg0, %c0_i32, %c0_i32_0 : i32, i32, i32
  }
}

</mosaic_0001>

<bundles_post_ra>
// kernel: ori_nodewise_forward.1
= control target key start
LH: loop header
LB: loop body
LE: loop exit
PB: predicated region body
PF: predicated region fallthrough
CT: control target
= control target key end

     0   :  { %s1319_s26 = smov 0   ;;  %s1793_s0 = inlined_call_operand.vmem [shape: f32[2,4,8,32], index: 0, kind: input, shape index: {}]   ;;  %s1794_s1 = inlined_call_operand.vmem [shape: bf16[32,384], index: 1, kind: input, shape index: {}]   ;;  %s1795_s2 = inlined_call_operand.vmem [shape: f32[1,128], index: 2, kind: input, shape index: {}]   ;;  %s1796_s3 = inlined_call_operand.vmem [shape: bf16[128,128], index: 3, kind: input, shape index: {}]   ;;  %s1797_s4 = inlined_call_operand.vmem [shape: f32[1,128], index: 4, kind: input, shape index: {}]   ;;  %s1798_s5 = inlined_call_operand.vmem [shape: bf16[1,128], index: 5, kind: input, shape index: {}]   ;;  %s1799_s6 = inlined_call_operand.<no memory space> [shape: f32[1,1], index: 6, kind: input, shape index: {}]   ;;  %s1800_s7 = inlined_call_operand.vmem [shape: f32[2,1,512], index: 7, kind: output, shape index: {}]  }
   0x1   :  { %12 = sst [smem:[#allocation2]] %s1799_s6 }
   0x2 LB: > { %s1138_s27 = sadd.s32 4294967295, %s1274_s26   ;;  %p1142_p0 = scmp.ge.s32.totalorder %s1274_s26, 1  ;;  %s1274_s26 = sphi %s1319_s26, %s18_s26  }
   0x3   : > { %p238_p1 = scmp.lt.s32.totalorder %s1274_s26, 3 }
   0x5   : > { %p239_p2 = pnand %p1142_p0, %p238_p1 }
   0x6   : > { %p269_p3 = scmp.lt.s32.totalorder (!%p239_p2), %s1138_s27, 1 }
   0x7   : > { %242 = sbr.rel (%p239_p2) target bundleno = 718 (0x2ce), region = 48 }
   0xc   : > { %v1160_v0 = vld [vmem:[%s1794_s1 + $0x18] sm:$0xf]  ;;  %v1216_v1 = vld [vmem:[%s1794_s1 + $0x20] sm:$0xf0]  ;;  %v1215_v2 = vld [vmem:[%s1794_s1 + $0x1c] sm:$0xf] }
   0xd   : > { %v1161_v3 = vor.u32 %v1216_v1, %v1160_v0  ;;  %v1162_v4 = vld [vmem:[%s1794_s1 + $0x24] sm:$0xf0]  ;;  %v1168_v5 = vld [vmem:[%s1794_s1 + $0x20] sm:$0xf]  ;;  %v1217_v6 = vld [vmem:[%s1794_s1 + $0x28] sm:$0xf0] }
   0xe   : > { %v1165_v7 = vor.u32 %v1215_v2, %v1162_v4  ;;  %v1169_v8 = vor.u32 %v1217_v6, %v1168_v5  ;;  %v1148_v9 = vld [vmem:[%s1794_s1] sm:$0xf]  ;;  %v1213_v10 = vld [vmem:[%s1794_s1 + $0x8] sm:$0xf0]  ;;  %v1212_v11 = vld [vmem:[%s1794_s1 + $0x4] sm:$0xf] }
   0xf   : > { %341 = vmatpush.bf16.msra.mxu0 %v1161_v3  ;;  %v1149_v12 = vor.u32 %v1213_v10, %v1148_v9  ;;  %v1150_v13 = vld [vmem:[%s1794_s1 + $0xc] sm:$0xf0]  ;;  %v1156_v14 = vld [vmem:[%s1794_s1 + $0x8] sm:$0xf]  ;;  %v1214_v15 = vld [vmem:[%s1794_s1 + $0x10] sm:$0xf0] }
  0x10   : > { %354 = vmatpush.bf16.msra.mxu1 %v1165_v7  ;;  %367 = vmatpush.bf16.msra.mxu2 %v1169_v8  ;;  %v1153_v16 = vor.u32 %v1212_v11, %v1150_v13  ;;  %v1157_v17 = vor.u32 %v1214_v15, %v1156_v14  ;;  %v1225_v18 = vld [vmem:[%s1796_s3 + $0x38] sm:$0xff]  ;;  %s1808_s27 = smov (!%p269_p3, %s1138_s27), 1  ;;  %v1224_v19 = vld [vmem:[%s1796_s3 + $0x30] sm:$0xff]  ;;  %vm283_vm0 = vcmask 261120   ;;  %v1223_v20 = vld [vmem:[%s1796_s3 + $0x28] sm:$0xff] }
  0x11   : > { %1227 = vmatpush.bf16.msra.mxu3 %v1225_v18  ;;  %s1211_s10 = sshll.u32 %s1808_s27, 5  ;;  %v1222_v31 = vld [vmem:[%s1796_s3 + $0x20] sm:$0xff]  ;;  %v1221_v34 = vld [vmem:[%s1796_s3 + $0x18] sm:$0xff]  ;;  %v1220_v35 = vld [vmem:[%s1796_s3 + $0x10] sm:$0xff]  ;;  %s1145_s11 = sshll.u32 %s1808_s27, 2 }
  0x12   : > { %s273_s13 = scalar_lea.vmem %s1793_s0, %s1211_s10  ;;  %v1219_v36 = vld [vmem:[%s1796_s3 + $0x8] sm:$0xff]  ;;  %v1218_v37 = vld [vmem:[%s1796_s3] sm:$0xff]  ;;  %s936_s10 = sld [smem:[#allocation2]] }
  0x13   : > { %342 = vmatpush.bf16.msra.mxu0 %v1149_v12  ;;  %v279_v21 = vld [vmem:[%s273_s13] sm:$0xff]  ;;  %v280_v22 = vld [vmem:[%s273_s13 + $0x8] sm:$0xff]  ;;  %v281_v23 = vld [vmem:[%s273_s13 + $0x10] sm:$0xff]  ;;  %s277_s14 = scalar_lea.vmem %s1800_s7, %s1145_s11 }
  0x14   : > { %355 = vmatpush.bf16.msra.mxu1 %v1153_v16  ;;  %368 = vmatpush.bf16.msra.mxu2 %v1157_v17  ;;  %v282_v24 = vld [vmem:[%s273_s13 + $0x18] sm:$0xff]  ;;  %v284_v25 = vsel %vm283_vm0, %v279_v21, -inf  ;;  %v285_v26 = vsel %vm283_vm0, %v280_v22, -inf  ;;  %v286_v27 = vsel %vm283_vm0, %v281_v23, -inf  ;;  %v1250_v54 = vld [vmem:[%s1795_s2] ss:$0 sm:$0xff] }
  0x15   : > { %1229 = vmatpush.bf16.msra.mxu3 %v1224_v19  ;;  %v287_v28 = vsel %vm283_vm0, %v282_v24, -inf  ;;  %v288_v29 = vmax.f32 %v284_v25, %v285_v26 }
  0x16   : > { %v289_v30 = vmax.f32 %v286_v27, %v287_v28 }
  0x18   : > { %670 = vmatpush.bf16.msrb.mxu1 %v1225_v18  ;;  %1226 = vmatpush.bf16.msrb.mxu2 %v1225_v18  ;;  %v290_v32 = vmax.f32 %v288_v29, %v289_v30 }
  0x19   : > { %1231 = vmatpush.bf16.msra.mxu3 %v1223_v20 }
  0x1a   : > { %v291_v33 = vpack.c.bf16 %v290_v32, %v290_v32 }
  0x1c   : > { %671 = vmatpush.bf16.msrb.mxu1 %v1224_v19  ;;  %1228 = vmatpush.bf16.msrb.mxu2 %v1224_v19 }
  0x1d   : > { %1233 = vmatpush.bf16.msra.mxu3 %v1222_v31  ;;  %1170 = vmatmul.msk.bf16.vlgmr.msra.gmra.mxu0 %vm283_vm0, %v291_v33 }
  0x1e   : > { %1171 = vmatmul.msk.bf16.vlgmr.msra.gmra.mxu1 %vm283_vm0, %v291_v33  ;;  %1172 = vmatmul.msk.bf16.vlgmr.msra.gmra.mxu2 %vm283_vm0, %v291_v33 }
  0x20   : > { %672 = vmatpush.bf16.msrb.mxu1 %v1223_v20  ;;  %1230 = vmatpush.bf16.msrb.mxu2 %v1223_v20 }
  0x21   : > { %1235 = vmatpush.bf16.msra.mxu3 %v1221_v34 }
  0x24   : > { %673 = vmatpush.bf16.msrb.mxu1 %v1222_v31  ;;  %1232 = vmatpush.bf16.msrb.mxu2 %v1222_v31 }
  0x25   : > { %1237 = vmatpush.bf16.msra.mxu3 %v1220_v35 }
  0x28   : > { %674 = vmatpush.bf16.msrb.mxu1 %v1221_v34  ;;  %1234 = vmatpush.bf16.msrb.mxu2 %v1221_v34 }
  0x29   : > { %1239 = vmatpush.bf16.msra.mxu3 %v1219_v36 }
  0x2c   : > { %675 = vmatpush.bf16.msrb.mxu1 %v1220_v35  ;;  %1236 = vmatpush.bf16.msrb.mxu2 %v1220_v35 }
  0x2d   : > { %1241 = vmatpush.bf16.msra.mxu3 %v1218_v37 }
  0x30   : > { %676 = vmatpush.bf16.msrb.mxu1 %v1219_v36  ;;  %1238 = vmatpush.bf16.msrb.mxu2 %v1219_v36 }
  0x34   : > { %677 = vmatpush.bf16.msrb.mxu1 %v1218_v37  ;;  %1240 = vmatpush.bf16.msrb.mxu2 %v1218_v37 }
  0x9a   : > { %v1400_v38 = vpop.f32.mrf.mxu0 }
  0x9b   : > { %v357_v39 = vpop.f32.mrf.mxu1  ;;  %v420_v40 = vrot.slane %v1400_v38, 2  ;;  %v423_v41 = vrot.slane %v1400_v38, 5  ;;  %v1405_v42 = vperm.slane %v1400_v38, 0  ;;  %v421_v10 = vrot.slane %v1400_v38, 3 }
  0x9c   : > { %v375_v45 = vrot.slane %v357_v39, 1  ;;  %v376_v46 = vrot.slane %v357_v39, 2  ;;  %v377_v47 = vrot.slane %v357_v39, 3  ;;  %v378_v48 = vrot.slane %v357_v39, 4 }
  0x9d   : > { %v1407_v43 = vperm.slane %v420_v40, 0  ;;  %v1409_v44 = vperm.slane %v423_v41, 0  ;;  %v379_v49 = vrot.slane %v357_v39, 5  ;;  %v380_v50 = vrot.slane %v357_v39, 6 }
  0x9e   : > { %v381_v51 = vrot.slane %v357_v39, 7  ;;  %v382_v52 = vperm.slane %v357_v39, 0  ;;  %v383_v53 = vperm.slane %v375_v45, 0  ;;  %v384_v55 = vperm.slane %v376_v46, 0 }
  0x9f   : > { %v385_v56 = vperm.slane %v377_v47, 0  ;;  %v386_v57 = vperm.slane %v378_v48, 0  ;;  %v387_v58 = vperm.slane %v379_v49, 0  ;;  %v388_v60 = vperm.slane %v380_v50, 0 }
  0xa0   : > { %v389_v61 = vperm.slane %v381_v51, 0  ;;  %v1443_v30 = vperm.slane %v421_v10, 0  ;;  %v419_v32 = vrot.slane %v1400_v38, 1  ;;  %v422_v47 = vrot.slane %v1400_v38, 4 }
  0xa1   : > { %v370_v59 = vpop.f32.mrf.mxu2  ;;  %v424_v48 = vrot.slane %v1400_v38, 6  ;;  %v425_v51 = vrot.slane %v1400_v38, 7 }
  0xa2   : > { %v398_v62 = vadd.f32 %v382_v52, %v370_v59  ;;  %v399_v63 = vadd.f32 %v383_v53, %v370_v59  ;;  %v346_v0 = vpop.f32.mrf.mxu0  ;;  %v400_v2 = vadd.f32 %v384_v55, %v370_v59  ;;  %v401_v3 = vadd.f32 %v385_v56, %v370_v59 }
  0xa3   : > { %v359_v1 = vpop.f32.mrf.mxu1  ;;  %v402_v4 = vadd.f32 %v386_v57, %v370_v59  ;;  %v403_v5 = vadd.f32 %v387_v58, %v370_v59  ;;  %v404_v6 = vadd.f32 %v388_v60, %v370_v59  ;;  %v405_v7 = vadd.f32 %v389_v61, %v370_v59 }
  0xa4   : > { %v1414_v8 = vadd.f32 %v1250_v54, %v398_v62  ;;  %v1416_v9 = vadd.f32 %v1250_v54, %v399_v63  ;;  %v1423_v13 = vadd.f32 %v1250_v54, %v400_v2  ;;  %v1425_v14 = vadd.f32 %v1250_v54, %v401_v3 }
  0xa5   : > { %v1419_v11 = vadd.f32 %v1250_v54, %v402_v4  ;;  %v1421_v12 = vadd.f32 %v1250_v54, %v403_v5  ;;  %v1439_v21 = vadd.f32 %v1250_v54, %v404_v6  ;;  %v1441_v22 = vadd.f32 %v1250_v54, %v405_v7 }
  0xa6   : > { %v442_v15 = vadd.f32 %v1405_v42, %v1414_v8  ;;  %v443_v16 = vadd.f32 %v1405_v42, %v1416_v9  ;;  %v482_v19 = vadd.f32 %v1409_v44, %v1414_v8  ;;  %v483_v20 = vadd.f32 %v1409_v44, %v1416_v9 }
  0xa7   : > { %v462_v17 = vadd.f32 %v1407_v43, %v1419_v11  ;;  %v463_v18 = vadd.f32 %v1407_v43, %v1421_v12  ;;  %v444_v35 = vadd.f32 %v1405_v42, %v1423_v13  ;;  %v445_v36 = vadd.f32 %v1405_v42, %v1425_v14 }
  0xa8   : > { %v506_v23 = vmax.f32 %v442_v15, 0.0  ;;  %v507_v24 = vmax.f32 %v443_v16, 0.0  ;;  %v546_v28 = vmax.f32 %v482_v19, 0.0  ;;  %v547_v29 = vmax.f32 %v483_v20, 0.0 }
  0xa9   : > { %v372_v25 = vpop.f32.mrf.mxu2  ;;  %v526_v26 = vmax.f32 %v462_v17, 0.0  ;;  %v527_v27 = vmax.f32 %v463_v18, 0.0  ;;  %v464_v37 = vadd.f32 %v1407_v43, %v1439_v21  ;;  %v465_v39 = vadd.f32 %v1407_v43, %v1441_v22 }
  0xaa   : > { %v570_v31 = vpack.c.bf16 %v507_v24, %v506_v23  ;;  %v590_v34 = vpack.c.bf16 %v547_v29, %v546_v28  ;;  %v484_v40 = vadd.f32 %v1409_v44, %v1423_v13  ;;  %v485_v41 = vadd.f32 %v1409_v44, %v1425_v14 }
  0xab   : > { %v580_v33 = vpack.c.bf16 %v527_v27, %v526_v26  ;;  %v446_v45 = vadd.f32 %v1405_v42, %v1419_v11  ;;  %v447_v46 = vadd.f32 %v1405_v42, %v1421_v12  ;;  %v466_v49 = vadd.f32 %v1443_v30, %v1414_v8 }
  0xac   : > { %678 = vmatmul.bf16.vlgmr.msrb.gmra.mxu1 %v570_v31  ;;  %778 = vmatmul.bf16.vlgmr.msra.gmra.mxu3 %v590_v34  ;;  %v467_v50 = vadd.f32 %v1443_v30, %v1416_v9  ;;  %v1469_v52 = vperm.slane %v419_v32, 0  ;;  %v486_v53 = vadd.f32 %v1409_v44, %v1419_v11  ;;  %v487_v54 = vadd.f32 %v1409_v44, %v1421_v12 }
  0xad   : > { %728 = vmatmul.bf16.vlgmr.msrb.gmra.mxu2 %v580_v33  ;;  %v508_v55 = vmax.f32 %v444_v35, 0.0  ;;  %v509_v56 = vmax.f32 %v445_v36, 0.0  ;;  %v528_v57 = vmax.f32 %v464_v37, 0.0  ;;  %v529_v58 = vmax.f32 %v465_v39, 0.0 }
  0xae   : > { %v548_v59 = vmax.f32 %v484_v40, 0.0  ;;  %v549_v60 = vmax.f32 %v485_v41, 0.0  ;;  %v510_v61 = vmax.f32 %v446_v45, 0.0  ;;  %v511_v62 = vmax.f32 %v447_v46, 0.0 }
  0xaf   : > { %v1475_v63 = vperm.slane %v424_v48, 0  ;;  %v530_v0 = vmax.f32 %v466_v49, 0.0  ;;  %v531_v38 = vmax.f32 %v467_v50, 0.0  ;;  %v1477_v1 = vperm.slane %v422_v47, 0 }
  0xb0   : > { %v1479_v2 = vperm.slane %v425_v51, 0  ;;  %v550_v3 = vmax.f32 %v486_v53, 0.0  ;;  %v551_v4 = vmax.f32 %v487_v54, 0.0  ;;  %v571_v5 = vpack.c.bf16 %v509_v56, %v508_v55 }
  0xb1   : > { %v581_v6 = vpack.c.bf16 %v529_v58, %v528_v57  ;;  %v450_v7 = vadd.f32 %v1469_v52, %v1414_v8  ;;  %v451_v10 = vadd.f32 %v1469_v52, %v1416_v9  ;;  %v591_v15 = vpack.c.bf16 %v549_v60, %v548_v59 }
  0xb2   : > { %v1485_v16 = vpack.c.bf16 %v511_v62, %v510_v61  ;;  %v470_v17 = vadd.f32 %v1443_v30, %v1419_v11  ;;  %v471_v18 = vadd.f32 %v1443_v30, %v1421_v12  ;;  %v1491_v19 = vpack.c.bf16 %v531_v38, %v530_v0 }
  0xb3   : > { %v514_v20 = vmax.f32 %v450_v7, 0.0  ;;  %v515_v23 = vmax.f32 %v451_v10, 0.0  ;;  %v490_v24 = vadd.f32 %v1475_v63, %v1414_v8  ;;  %v1495_v25 = vpack.c.bf16 %v551_v4, %v550_v3 }
  0xb4   : > { %v534_v26 = vmax.f32 %v470_v17, 0.0  ;;  %v535_v27 = vmax.f32 %v471_v18, 0.0  ;;  %v491_v28 = vadd.f32 %v1475_v63, %v1416_v9  ;;  %v452_v32 = vadd.f32 %v1469_v52, %v1423_v13 }
  0xb5   : > { %v1499_v29 = vpack.c.bf16 %v515_v23, %v514_v20  ;;  %v554_v31 = vmax.f32 %v490_v24, 0.0  ;;  %v453_v33 = vadd.f32 %v1469_v52, %v1425_v14  ;;  %v472_v36 = vadd.f32 %v1443_v30, %v1439_v21 }
  0xb6   : > { %v1505_v34 = vpack.c.bf16 %v535_v27, %v534_v26  ;;  %v555_v35 = vmax.f32 %v491_v28, 0.0  ;;  %v473_v37 = vadd.f32 %v1443_v30, %v1441_v22  ;;  %v516_v39 = vmax.f32 %v452_v32, 0.0 }
  0xb7   : > { %v517_v40 = vmax.f32 %v453_v33, 0.0  ;;  %v492_v41 = vadd.f32 %v1475_v63, %v1423_v13  ;;  %v493_v45 = vadd.f32 %v1475_v63, %v1425_v14  ;;  %v536_v47 = vmax.f32 %v472_v36, 0.0 }
  0xb8   : > { %v1515_v46 = vpack.c.bf16 %v555_v35, %v554_v31  ;;  %v537_v48 = vmax.f32 %v473_v37, 0.0  ;;  %v454_v49 = vadd.f32 %v1469_v52, %v1419_v11  ;;  %v455_v54 = vadd.f32 %v1469_v52, %v1421_v12 }
  0xb9   : > { %v1519_v50 = vpack.c.bf16 %v517_v40, %v516_v39  ;;  %v556_v51 = vmax.f32 %v492_v41, 0.0  ;;  %v557_v53 = vmax.f32 %v493_v45, 0.0  ;;  %v474_v57 = vadd.f32 %v1477_v1, %v1414_v8 }
  0xba   : > { %v1523_v55 = vpack.c.bf16 %v537_v48, %v536_v47  ;;  %v518_v56 = vmax.f32 %v454_v49, 0.0  ;;  %v475_v58 = vadd.f32 %v1477_v1, %v1416_v9  ;;  %v519_v60 = vmax.f32 %v455_v54, 0.0 }
  0xbb   : > { %v1529_v59 = vpack.c.bf16 %v557_v53, %v556_v51  ;;  %v494_v61 = vadd.f32 %v1475_v63, %v1419_v11  ;;  %v495_v62 = vadd.f32 %v1475_v63, %v1421_v12  ;;  %v538_v0 = vmax.f32 %v474_v57, 0.0 }
  0xbc   : > { %683 = vmatmul.bf16.gmra.mxu1 %v571_v5  ;;  %783 = vmatmul.bf16.gmra.mxu3 %v591_v15  ;;  %v539_v38 = vmax.f32 %v475_v58, 0.0  ;;  %v456_v3 = vadd.f32 %v1469_v52, %v1439_v21  ;;  %v457_v4 = vadd.f32 %v1469_v52, %v1441_v22  ;;  %v1539_v5 = vpack.c.bf16 %v519_v60, %v518_v56 }
  0xbd   : > { %733 = vmatmul.bf16.gmra.mxu2 %v581_v6  ;;  %v558_v6 = vmax.f32 %v494_v61, 0.0  ;;  %v559_v7 = vmax.f32 %v495_v62, 0.0  ;;  %v476_v10 = vadd.f32 %v1477_v1, %v1423_v13  ;;  %v477_v20 = vadd.f32 %v1477_v1, %v1425_v14 }
  0xbe   : > { %v1543_v15 = vpack.c.bf16 %v539_v38, %v538_v0  ;;  %v520_v17 = vmax.f32 %v456_v3, 0.0  ;;  %v521_v18 = vmax.f32 %v457_v4, 0.0  ;;  %v496_v52 = vadd.f32 %v1475_v63, %v1439_v21 }
  0xbf   : > { %v1547_v23 = vpack.c.bf16 %v559_v7, %v558_v6  ;;  %v540_v24 = vmax.f32 %v476_v10, 0.0  ;;  %v497_v26 = vadd.f32 %v1475_v63, %v1441_v22  ;;  %v541_v28 = vmax.f32 %v477_v20, 0.0 }
  0xc0   : > { %v1553_v27 = vpack.c.bf16 %v521_v18, %v520_v17  ;;  %v458_v31 = vadd.f32 %v1407_v43, %v1414_v8  ;;  %v459_v32 = vadd.f32 %v1407_v43, %v1416_v9  ;;  %v560_v33 = vmax.f32 %v496_v52, 0.0 }
  0xc1   : > { %v561_v35 = vmax.f32 %v497_v26, 0.0  ;;  %v478_v36 = vadd.f32 %v1477_v1, %v1419_v11  ;;  %v479_v37 = vadd.f32 %v1477_v1, %v1421_v12  ;;  %v1563_v39 = vpack.c.bf16 %v541_v28, %v540_v24 }
  0xc2   : > { %v522_v63 = vmax.f32 %v458_v31, 0.0  ;;  %v523_v40 = vmax.f32 %v459_v32, 0.0  ;;  %v498_v41 = vadd.f32 %v1479_v2, %v1414_v8  ;;  %v499_v49 = vadd.f32 %v1479_v2, %v1416_v9 }
  0xc3   : > { %v1567_v45 = vpack.c.bf16 %v561_v35, %v560_v33  ;;  %v542_v47 = vmax.f32 %v478_v36, 0.0  ;;  %v543_v48 = vmax.f32 %v479_v37, 0.0  ;;  %v460_v54 = vadd.f32 %v1407_v43, %v1423_v13 }
  0xc4   : > { %v1571_v51 = vpack.c.bf16 %v523_v40, %v522_v63  ;;  %v562_v53 = vmax.f32 %v498_v41, 0.0  ;;  %v461_v56 = vadd.f32 %v1407_v43, %v1425_v14  ;;  %v563_v58 = vmax.f32 %v499_v49, 0.0 }
  0xc5   : > { %v588_v57 = vpack.c.bf16 %v543_v48, %v542_v47  ;;  %v480_v8 = vadd.f32 %v1477_v1, %v1439_v21  ;;  %v481_v60 = vadd.f32 %v1477_v1, %v1441_v22  ;;  %v524_v61 = vmax.f32 %v460_v54, 0.0 }
  0xc6   : > { %v525_v62 = vmax.f32 %v461_v56, 0.0  ;;  %v500_v9 = vadd.f32 %v1479_v2, %v1423_v13  ;;  %v501_v0 = vadd.f32 %v1479_v2, %v1425_v14  ;;  %v598_v38 = vpack.c.bf16 %v563_v58, %v562_v53 }
  0xc7   : > { %v544_v3 = vmax.f32 %v480_v8, 0.0  ;;  %v545_v4 = vmax.f32 %v481_v60, 0.0  ;;  %v502_v43 = vadd.f32 %v1479_v2, %v1419_v11  ;;  %v503_v1 = vadd.f32 %v1479_v2, %v1421_v12 }
  0xc8   : > { %v1587_v6 = vpack.c.bf16 %v525_v62, %v524_v61  ;;  %v564_v7 = vmax.f32 %v500_v9, 0.0  ;;  %v565_v10 = vmax.f32 %v501_v0, 0.0  ;;  %v504_v20 = vadd.f32 %v1479_v2, %v1439_v21 }
  0xc9   : > { %v1592_v17 = vpack.c.bf16 %v545_v4, %v544_v3  ;;  %v566_v18 = vmax.f32 %v502_v43, 0.0  ;;  %v505_v24 = vadd.f32 %v1479_v2, %v1441_v22  ;;  %v567_v52 = vmax.f32 %v503_v1, 0.0 }
  0xca   : > { %v1600_v11 = vpack.c.bf16 %v565_v10, %v564_v7  ;;  %v568_v26 = vmax.f32 %v504_v20, 0.0  ;;  %v448_v31 = vadd.f32 %v1405_v42, %v1439_v21  ;;  %v449_v32 = vadd.f32 %v1405_v42, %v1441_v22 }
  0xcb   : > { %v569_v12 = vmax.f32 %v505_v24, 0.0  ;;  %v1602_v28 = vpack.c.bf16 %v567_v52, %v566_v18  ;;  %v468_v2 = vadd.f32 %v1443_v30, %v1423_v13  ;;  %v489_v33 = vadd.f32 %v1409_v44, %v1441_v22  ;;  %v1634_v22 = vld [vmem:[%s1797_s4] ss:$0 sm:$0xff] }
  0xcc   : > { %688 = vmatmul.bf16.gmra.mxu1 %v1485_v16  ;;  %788 = vmatmul.bf16.gmra.mxu3 %v1495_v25  ;;  %v488_v25 = vadd.f32 %v1409_v44, %v1439_v21  ;;  %v512_v35 = vmax.f32 %v448_v31, 0.0  ;;  %v513_v36 = vmax.f32 %v449_v32, 0.0 }
  0xcd   : > { %738 = vmatmul.bf16.gmra.mxu2 %v1491_v19  ;;  %v1604_v16 = vpack.c.bf16 %v569_v12, %v568_v26  ;;  %v469_v19 = vadd.f32 %v1443_v30, %v1425_v14  ;;  %v532_v37 = vmax.f32 %v468_v2, 0.0  ;;  %v553_v41 = vmax.f32 %v489_v33, 0.0 }
  0xce   : > { %v552_v40 = vmax.f32 %v488_v25, 0.0  ;;  %v573_v47 = vpack.c.bf16 %v513_v36, %v512_v35 }
  0xcf   : > { %v533_v63 = vmax.f32 %v469_v19, 0.0 }
  0xd0   : > { %v593_v48 = vpack.c.bf16 %v553_v41, %v552_v40 }
  0xd1   : > { %v583_v42 = vpack.c.bf16 %v533_v63, %v532_v37 }
  0xdc   : > { %693 = vmatmul.bf16.gmra.mxu1 %v573_v47  ;;  %793 = vmatmul.bf16.gmra.mxu3 %v593_v48 }
  0xdd   : > { %743 = vmatmul.bf16.gmra.mxu2 %v583_v42 }
  0xec   : > { %698 = vmatmul.bf16.gmra.mxu1 %v1499_v29  ;;  %798 = vmatmul.bf16.gmra.mxu3 %v1515_v46 }
  0xed   : > { %748 = vmatmul.bf16.gmra.mxu2 %v1505_v34 }
  0xfc   : > { %703 = vmatmul.bf16.gmra.mxu1 %v1519_v50  ;;  %803 = vmatmul.bf16.gmra.mxu3 %v1529_v59 }
  0xfd   : > { %753 = vmatmul.bf16.gmra.mxu2 %v1523_v55 }
 0x10c   : > { %708 = vmatmul.bf16.gmra.mxu1 %v1539_v5  ;;  %808 = vmatmul.bf16.gmra.mxu3 %v1547_v23 }
 0x10d   : > { %758 = vmatmul.bf16.gmra.mxu2 %v1543_v15 }
 0x11c   : > { %713 = vmatmul.bf16.gmra.mxu1 %v1553_v27  ;;  %813 = vmatmul.bf16.gmra.mxu3 %v1567_v45 }
 0x11d   : > { %763 = vmatmul.bf16.gmra.mxu2 %v1563_v39 }
 0x129   : > { %v679_v44 = vpop.f32.mrf.mxu1 }
 0x12a   : > { %v680_v29 = vadd.f32 %v1634_v22, %v679_v44 }
 0x12c   : > { %718 = vmatmul.bf16.gmra.mxu1 %v1571_v51  ;;  %818 = vmatmul.bf16.gmra.mxu3 %v598_v38  ;;  %v839_v27 = vmax.f32 %v680_v29, 0.0 }
 0x12d   : > { %768 = vmatmul.bf16.gmra.mxu2 %v588_v57 }
 0x12f   : > { %v779_v14 = vpop.f32.mrf.mxu3 }
 0x130   : > { %v729_v13 = vpop.f32.mrf.mxu2  ;;  %v780_v46 = vadd.f32 %v1634_v22, %v779_v14 }
 0x131   : > { %v681_v21 = vpop.f32.mrf.mxu1  ;;  %v730_v34 = vadd.f32 %v1634_v22, %v729_v13 }
 0x132   : > { %v682_v30 = vadd.f32 %v1634_v22, %v681_v21  ;;  %v879_v45 = vmax.f32 %v780_v46, 0.0 }
 0x133   : > { %v859_v39 = vmax.f32 %v730_v34, 0.0 }
 0x134   : > { %v840_v50 = vmax.f32 %v682_v30, 0.0 }
 0x136   : > { %v1643_v53 = vpack.c.bf16 %v840_v50, %v839_v27 }
 0x137   : > { %v781_v59 = vpop.f32.mrf.mxu3 }
 0x138   : > { %v731_v55 = vpop.f32.mrf.mxu2  ;;  %v782_v15 = vadd.f32 %v1634_v22, %v781_v59 }
 0x139   : > { %v732_v5 = vadd.f32 %v1634_v22, %v731_v55  ;;  %v684_v23 = vpop.f32.mrf.mxu1 }
 0x13a   : > { %v880_v51 = vmax.f32 %v782_v15, 0.0  ;;  %v685_v61 = vadd.f32 %v1634_v22, %v684_v23 }
 0x13b   : > { %v860_v49 = vmax.f32 %v732_v5, 0.0 }
 0x13c   : > { %723 = vmatmul.bf16.gmra.mxu1 %v1587_v6  ;;  %v1647_v56 = vpack.c.bf16 %v880_v51, %v879_v45  ;;  %823 = vmatmul.bf16.gmra.mxu3 %v1600_v11  ;;  %v841_v43 = vmax.f32 %v685_v61, 0.0 }
 0x13d   : > { %v1645_v54 = vpack.c.bf16 %v860_v49, %v859_v39  ;;  %773 = vmatmul.bf16.gmra.mxu2 %v1592_v17 }
 0x13f   : > { %v784_v58 = vpop.f32.mrf.mxu3 }
 0x140   : > { %v734_v57 = vpop.f32.mrf.mxu2  ;;  %v785_v51 = vadd.f32 %v1634_v22, %v784_v58 }
 0x141   : > { %v686_v8 = vpop.f32.mrf.mxu1  ;;  %v735_v62 = vadd.f32 %v1634_v22, %v734_v57 }
 0x142   : > { %v687_v60 = vadd.f32 %v1634_v22, %v686_v8 }
 0x143   : > { %v861_v6 = vmax.f32 %v735_v62, 0.0 }
 0x144   : > { %v842_v9 = vmax.f32 %v687_v60, 0.0 }
 0x146   : > { %v1655_v10 = vpack.c.bf16 %v842_v9, %v841_v43 }
 0x147   : > { %v786_v38 = vpop.f32.mrf.mxu3 }
 0x148   : > { %v736_v0 = vpop.f32.mrf.mxu2  ;;  %v787_v39 = vadd.f32 %v1634_v22, %v786_v38 }
 0x149   : > { %v737_v3 = vadd.f32 %v1634_v22, %v736_v0  ;;  %v689_v4 = vpop.f32.mrf.mxu1 }
 0x14a   : > { %v690_v11 = vadd.f32 %v1634_v22, %v689_v4  ;;  %v882_v62 = vmax.f32 %v787_v39, 0.0  ;;  %v881_v4 = vmax.f32 %v785_v51, 0.0 }
 0x14b   : > { %v862_v7 = vmax.f32 %v737_v3, 0.0 }
 0x14c   : > { %828 = vmatmul.bf16.gmra.mxu3 %v1602_v28  ;;  %v843_v19 = vmax.f32 %v690_v11, 0.0 }
 0x14d   : > { %v1657_v1 = vpack.c.bf16 %v862_v7, %v861_v6  ;;  %v925_v7 = vpack.c.bf16 %v882_v62, %v881_v4 }
 0x14f   : > { %v789_v18 = vpop.f32.mrf.mxu3 }
 0x150   : > { %v739_v17 = vpop.f32.mrf.mxu2  ;;  %v790_v50 = vadd.f32 %v1634_v22, %v789_v18 }
 0x151   : > { %v691_v20 = vpop.f32.mrf.mxu1  ;;  %v740_v52 = vadd.f32 %v1634_v22, %v739_v17 }
 0x152   : > { %v692_v24 = vadd.f32 %v1634_v22, %v691_v20  ;;  %v883_v23 = vmax.f32 %v790_v50, 0.0 }
 0x153   : > { %v863_v25 = vmax.f32 %v740_v52, 0.0 }
 0x154   : > { %v844_v26 = vmax.f32 %v692_v24, 0.0 }
 0x156   : > { %v1664_v35 = vpack.c.bf16 %v844_v26, %v843_v19 }
 0x157   : > { %v791_v31 = vpop.f32.mrf.mxu3 }
 0x158   : > { %v741_v12 = vpop.f32.mrf.mxu2  ;;  %v792_v34 = vadd.f32 %v1634_v22, %v791_v31 }
 0x159   : > { %v742_v32 = vadd.f32 %v1634_v22, %v741_v12  ;;  %v694_v2 = vpop.f32.mrf.mxu1 }
 0x15a   : > { %v695_v41 = vadd.f32 %v1634_v22, %v694_v2  ;;  %v884_v5 = vmax.f32 %v792_v34, 0.0 }
 0x15b   : > { %v864_v33 = vmax.f32 %v742_v32, 0.0 }
 0x15c   : > { %833 = vmatmul.bf16.gmra.mxu3 %v1604_v16  ;;  %v845_v21 = vmax.f32 %v695_v41, 0.0  ;;  %v926_v45 = vpack.c.bf16 %v884_v5, %v883_v23 }
 0x15d   : > { %v1666_v28 = vpack.c.bf16 %v864_v33, %v863_v25 }
 0x15f   : > { %v794_v37 = vpop.f32.mrf.mxu3 }
 0x160   : > { %v1669_v36 = vpop.f32.mrf.mxu2  ;;  %v795_v47 = vadd.f32 %v1634_v22, %v794_v37 }
 0x161   : > { %v696_v63 = vpop.f32.mrf.mxu1 }
 0x162   : > { %v697_v40 = vadd.f32 %v1634_v22, %v696_v63  ;;  %v885_v30 = vmax.f32 %v795_v47, 0.0 }
 0x164   : > { %v846_v42 = vmax.f32 %v697_v40, 0.0 }
 0x166   : > { %v1677_v29 = vpack.c.bf16 %v846_v42, %v845_v21 }
 0x167   : > { %v796_v44 = vpop.f32.mrf.mxu3 }
 0x168   : > { %v1674_v48 = vpop.f32.mrf.mxu2  ;;  %v797_v13 = vadd.f32 %v1634_v22, %v796_v44 }
 0x169   : > { %v699_v14 = vpop.f32.mrf.mxu1 }
 0x16a   : > { %v886_v16 = vmax.f32 %v797_v13, 0.0  ;;  %v700_v49 = vadd.f32 %v1634_v22, %v699_v14  ;;  %v747_v14 = vadd.f32 %v1634_v22, %v1674_v48 }
 0x16c   : > { %v927_v46 = vpack.c.bf16 %v886_v16, %v885_v30  ;;  %v847_v3 = vmax.f32 %v700_v49, 0.0  ;;  %v745_v30 = vadd.f32 %v1634_v22, %v1669_v36 }
 0x16e   : > { %964 = vmatpush.bf16.xpose.msra.mxu2 %v927_v46  ;;  %v865_v23 = vmax.f32 %v745_v30, 0.0 }
 0x16f   : > { %v799_v59 = vpop.f32.mrf.mxu3 }
 0x170   : > { %v749_v55 = vpop.f32.mrf.mxu2  ;;  %v800_v57 = vadd.f32 %v1634_v22, %v799_v59 }
 0x171   : > { %v701_v15 = vpop.f32.mrf.mxu1  ;;  %v750_v41 = vadd.f32 %v1634_v22, %v749_v55  ;;  %v866_v55 = vmax.f32 %v747_v14, 0.0 }
 0x172   : > { %v702_v27 = vadd.f32 %v1634_v22, %v701_v15  ;;  %v887_v43 = vmax.f32 %v800_v57, 0.0 }
 0x173   : > { %v867_v13 = vmax.f32 %v750_v41, 0.0  ;;  %v917_v49 = vpack.c.bf16 %v866_v55, %v865_v23 }
 0x174   : > { %v848_v8 = vmax.f32 %v702_v27, 0.0 }
 0x176   : > { %965 = vmatpush.bf16.xpose.msra.mxu2 %v926_v45  ;;  %v1689_v6 = vpack.c.bf16 %v848_v8, %v847_v3 }
 0x177   : > { %v801_v61 = vpop.f32.mrf.mxu3 }
 0x178   : > { %v751_v60 = vpop.f32.mrf.mxu2  ;;  %v802_v9 = vadd.f32 %v1634_v22, %v801_v61 }
 0x179   : > { %v1687_v0 = vpop.f32.mrf.mxu1  ;;  %v752_v37 = vadd.f32 %v1634_v22, %v751_v60 }
 0x17a   : > { %v888_v38 = vmax.f32 %v802_v9, 0.0 }
 0x17b   : > { %v868_v42 = vmax.f32 %v752_v37, 0.0 }
 0x17c   : > { %v1691_v17 = vpack.c.bf16 %v888_v38, %v887_v43 }
 0x17d   : > { %v918_v21 = vpack.c.bf16 %v868_v42, %v867_v13 }
 0x17e   : > { %966 = vmatpush.bf16.xpose.msra.mxu2 %v925_v7 }
 0x17f   : > { %v804_v18 = vpop.f32.mrf.mxu3 }
 0x180   : > { %v754_v58 = vpop.f32.mrf.mxu2  ;;  %v805_v11 = vadd.f32 %v1634_v22, %v804_v18 }
 0x181   : > { %v1693_v20 = vpop.f32.mrf.mxu1  ;;  %v755_v24 = vadd.f32 %v1634_v22, %v754_v58 }
 0x182   : > { %v889_v19 = vmax.f32 %v805_v11, 0.0 }
 0x183   : > { %v869_v2 = vmax.f32 %v755_v24, 0.0 }
 0x186   : > { %967 = vmatpush.bf16.xpose.msra.mxu2 %v1647_v56 }
 0x187   : > { %v806_v26 = vpop.f32.mrf.mxu3 }
 0x188   : > { %v756_v52 = vpop.f32.mrf.mxu2  ;;  %v807_v31 = vadd.f32 %v1634_v22, %v806_v26 }
 0x189   : > { %v757_v12 = vadd.f32 %v1634_v22, %v756_v52  ;;  %v709_v32 = vpop.f32.mrf.mxu1 }
 0x18a   : > { %v890_v33 = vmax.f32 %v807_v31, 0.0  ;;  %v710_v7 = vadd.f32 %v1634_v22, %v709_v32 }
 0x18b   : > { %v870_v25 = vmax.f32 %v757_v12, 0.0 }
 0x18c   : > { %v1701_v40 = vpack.c.bf16 %v890_v33, %v889_v19  ;;  %v851_v31 = vmax.f32 %v710_v7, 0.0  ;;  %v707_v19 = vadd.f32 %v1634_v22, %v1693_v20 }
 0x18d   : > { %v919_v63 = vpack.c.bf16 %v870_v25, %v869_v2 }
 0x18f   : > { %951 = vmatpush.bf16.xpose.msra.mxu1 %v919_v63  ;;  %v809_v47 = vpop.f32.mrf.mxu3  ;;  %v850_v63 = vmax.f32 %v707_v19, 0.0 }
 0x190   : > { %v759_v56 = vpop.f32.mrf.mxu2  ;;  %v810_v34 = vadd.f32 %v1634_v22, %v809_v47 }
 0x191   : > { %v711_v44 = vpop.f32.mrf.mxu1  ;;  %v760_v16 = vadd.f32 %v1634_v22, %v759_v56 }
 0x192   : > { %v891_v48 = vmax.f32 %v810_v34, 0.0  ;;  %v712_v4 = vadd.f32 %v1634_v22, %v711_v44 }
 0x193   : > { %v871_v27 = vmax.f32 %v760_v16, 0.0 }
 0x194   : > { %v852_v52 = vmax.f32 %v712_v4, 0.0 }
 0x196   : > { %v910_v25 = vpack.c.bf16 %v852_v52, %v851_v31 }
 0x197   : > { %952 = vmatpush.bf16.xpose.msra.mxu1 %v918_v21  ;;  %v811_v50 = vpop.f32.mrf.mxu3 }
 0x198   : > { %v761_v46 = vpop.f32.mrf.mxu2  ;;  %v812_v5 = vadd.f32 %v1634_v22, %v811_v50 }
 0x199   : > { %v762_v59 = vadd.f32 %v1634_v22, %v761_v46  ;;  %v714_v15 = vpop.f32.mrf.mxu1 }
 0x19a   : > { %v892_v45 = vmax.f32 %v812_v5, 0.0  ;;  %v715_v57 = vadd.f32 %v1634_v22, %v714_v15 }
 0x19b   : > { %v872_v39 = vmax.f32 %v762_v59, 0.0 }
 0x19c   : > { %v1714_v51 = vpack.c.bf16 %v892_v45, %v891_v48  ;;  %v853_v9 = vmax.f32 %v715_v57, 0.0 }
 0x19d   : > { %v1712_v36 = vpack.c.bf16 %v872_v39, %v871_v27 }
 0x19f   : > { %953 = vmatpush.bf16.xpose.msra.mxu1 %v917_v49  ;;  %v814_v60 = vpop.f32.mrf.mxu3 }
 0x1a0   : > { %v1717_v8 = vpop.f32.mrf.mxu2  ;;  %v815_v38 = vadd.f32 %v1634_v22, %v814_v60 }
 0x1a1   : > { %v716_v61 = vpop.f32.mrf.mxu1 }
 0x1a2   : > { %v717_v62 = vadd.f32 %v1634_v22, %v716_v61  ;;  %v893_v26 = vmax.f32 %v815_v38, 0.0  ;;  %v765_v38 = vadd.f32 %v1634_v22, %v1717_v8 }
 0x1a4   : > { %v854_v3 = vmax.f32 %v717_v62, 0.0 }
 0x1a6   : > { %v911_v43 = vpack.c.bf16 %v854_v3, %v853_v9 }
 0x1a7   : > { %954 = vmatpush.bf16.xpose.msra.mxu1 %v1666_v28  ;;  %v816_v18 = vpop.f32.mrf.mxu3  ;;  %v705_v28 = vadd.f32 %v1634_v22, %v1687_v0 }
 0x1a8   : > { %v766_v58 = vpop.f32.mrf.mxu2  ;;  %938 = vmatpush.bf16.xpose.msrb.mxu0 %v911_v43  ;;  %v817_v24 = vadd.f32 %v1634_v22, %v816_v18 }
 0x1a9   : > { %v719_v11 = vpop.f32.mrf.mxu1  ;;  %v849_v41 = vmax.f32 %v705_v28, 0.0  ;;  %v767_v4 = vadd.f32 %v1634_v22, %v766_v58 }
 0x1aa   : > { %v894_v12 = vmax.f32 %v817_v24, 0.0  ;;  %v720_v15 = vadd.f32 %v1634_v22, %v719_v11  ;;  %v873_v24 = vmax.f32 %v765_v38, 0.0 }
 0x1ab   : > { %v909_v56 = vpack.c.bf16 %v850_v63, %v849_v41  ;;  %v874_v18 = vmax.f32 %v767_v4, 0.0 }
 0x1ac   : > { %v1725_v2 = vpack.c.bf16 %v894_v12, %v893_v26  ;;  %v855_v49 = vmax.f32 %v720_v15, 0.0 }
 0x1ad   : > { %v921_v11 = vpack.c.bf16 %v874_v18, %v873_v24 }
 0x1af   : > { %955 = vmatpush.bf16.xpose.msra.mxu1 %v1657_v1  ;;  %v819_v33 = vpop.f32.mrf.mxu3 }
 0x1b0   : > { %v769_v32 = vpop.f32.mrf.mxu2  ;;  %939 = vmatpush.bf16.xpose.msrb.mxu0 %v910_v25  ;;  %v820_v47 = vadd.f32 %v1634_v22, %v819_v33  ;;  %v903_v25 = vld [vmem:[%s1798_s5] sm:$0x1] }
 0x1b1   : > { %v721_v37 = vpop.f32.mrf.mxu1  ;;  %v770_v62 = vadd.f32 %v1634_v22, %v769_v32 }
 0x1b2   : > { %v895_v13 = vmax.f32 %v820_v47, 0.0  ;;  %v722_v55 = vadd.f32 %v1634_v22, %v721_v37 }
 0x1b7   : > { %956 = vmatpush.bf16.xpose.msra.mxu1 %v1645_v54  ;;  %v821_v44 = vpop.f32.mrf.mxu3 }
 0x1b8   : > { %v771_v42 = vpop.f32.mrf.mxu2  ;;  %940 = vmatpush.bf16.xpose.msrb.mxu0 %v909_v56  ;;  %v822_v20 = vadd.f32 %v1634_v22, %v821_v44 }
 0x1b9   : > { %v724_v1 = vpop.f32.mrf.mxu1  ;;  %v772_v57 = vadd.f32 %v1634_v22, %v771_v42 }
 0x1ba   : > { %v896_v14 = vmax.f32 %v822_v20, 0.0  ;;  %v725_v21 = vadd.f32 %v1634_v22, %v724_v1  ;;  %v937_v1 = vstv %s936_s10 }
 0x1bb   : > { %v876_v3 = vmax.f32 %v772_v57, 0.0 }
 0x1bc   : > { %v1735_v0 = vpack.c.bf16 %v896_v14, %v895_v13  ;;  %v857_v54 = vmax.f32 %v725_v21, 0.0 }
 0x1bf   : > { %v824_v16 = vpop.f32.mrf.mxu3 }
 0x1c0   : > { %v774_v30 = vpop.f32.mrf.mxu2  ;;  %941 = vmatpush.bf16.xpose.msrb.mxu0 %v1689_v6  ;;  %v856_v6 = vmax.f32 %v722_v55, 0.0  ;;  %v825_v33 = vadd.f32 %v1634_v22, %v824_v16 }
 0x1c1   : > { %v726_v34 = vpop.f32.mrf.mxu1  ;;  %v775_v5 = vadd.f32 %v1634_v22, %v774_v30 }
 0x1c2   : > { %v727_v46 = vadd.f32 %v1634_v22, %v726_v34  ;;  %v912_v61 = vpack.c.bf16 %v856_v6, %v855_v49  ;;  %v897_v63 = vmax.f32 %v825_v33, 0.0 }
 0x1c3   : > { %v877_v39 = vmax.f32 %v775_v5, 0.0 }
 0x1c4   : > { %v858_v50 = vmax.f32 %v727_v46, 0.0 }
 0x1c6   : > { %v913_v59 = vpack.c.bf16 %v858_v50, %v857_v54 }
 0x1c7   : > { %v826_v27 = vpop.f32.mrf.mxu3 }
 0x1c8   : > { %v776_v23 = vpop.f32.mrf.mxu2  ;;  %942 = vmatpush.bf16.xpose.msrb.mxu0 %v1677_v29  ;;  %957 = vmatpush.bf16.xpose.msra.mxu1 %v913_v59  ;;  %v875_v29 = vmax.f32 %v770_v62, 0.0  ;;  %v827_v28 = vadd.f32 %v1634_v22, %v826_v27 }
 0x1c9   : > { %v777_v48 = vadd.f32 %v1634_v22, %v776_v23 }
 0x1ca   : > { %v922_v43 = vpack.c.bf16 %v876_v3, %v875_v29  ;;  %v898_v37 = vmax.f32 %v827_v28, 0.0 }
 0x1cb   : > { %v878_v45 = vmax.f32 %v777_v48, 0.0 }
 0x1cc   : > { %v933_v41 = vpack.c.bf16 %v898_v37, %v897_v63 }
 0x1cd   : > { %v923_v60 = vpack.c.bf16 %v878_v45, %v877_v39 }
 0x1cf   : > { %968 = vmatpush.bf16.xpose.msra.mxu2 %v923_v60  ;;  %v829_v9 = vpop.f32.mrf.mxu3 }
 0x1d0   : > { %943 = vmatpush.bf16.xpose.msrb.mxu0 %v1664_v35  ;;  %958 = vmatpush.bf16.xpose.msra.mxu1 %v912_v61 }
 0x1d7   : > { %969 = vmatpush.bf16.xpose.msra.mxu2 %v922_v43  ;;  %v831_v7 = vpop.f32.mrf.mxu3  ;;  %959 = vmatmul.bf16.vlgmr.msra.gmra.mxu1 %v903_v25 }
 0x1d8   : > { %944 = vmatpush.bf16.xpose.msrb.mxu0 %v1655_v10  ;;  %v832_v31 = vadd.f32 %v1634_v22, %v831_v7  ;;  %v830_v10 = vadd.f32 %v1634_v22, %v829_v9 }
 0x1df   : > { %970 = vmatpush.bf16.xpose.msra.mxu2 %v921_v11  ;;  %v834_v52 = vpop.f32.mrf.mxu3 }
 0x1e0   : > { %945 = vmatpush.bf16.xpose.msrb.mxu0 %v1643_v53  ;;  %v835_v35 = vadd.f32 %v1634_v22, %v834_v52  ;;  %v900_v53 = vmax.f32 %v832_v31, 0.0 }
 0x1e2   : > { %v901_v12 = vmax.f32 %v835_v35, 0.0 }
 0x1e7   : > { %971 = vmatpush.bf16.xpose.msra.mxu2 %v1712_v36  ;;  %v836_v58 = vpop.f32.mrf.mxu3  ;;  %946 = vmatmul.bf16.vlgmr.msrb.gmra.mxu0 %v903_v25  ;;  %v899_v36 = vmax.f32 %v830_v10, 0.0 }
 0x1e8   : > { %v837_v26 = vadd.f32 %v1634_v22, %v836_v58 }
 0x1e9   : > { %v934_v32 = vpack.c.bf16 %v900_v53, %v899_v36 }
 0x1ea   : > { %v902_v8 = vmax.f32 %v837_v26, 0.0 }
 0x1ec   : > { %v935_v19 = vpack.c.bf16 %v902_v8, %v901_v12 }
 0x1ee   : > { %977 = vmatpush.bf16.xpose.msra.mxu0 %v935_v19  ;;  %972 = vmatmul.bf16.vlgmr.msra.gmra.mxu2 %v903_v25 }
 0x1f6   : > { %978 = vmatpush.bf16.xpose.msra.mxu0 %v934_v32 }
 0x1fe   : > { %979 = vmatpush.bf16.xpose.msra.mxu0 %v933_v41 }
 0x206   : > { %980 = vmatpush.bf16.xpose.msra.mxu0 %v1735_v0 }
 0x20e   : > { %981 = vmatpush.bf16.xpose.msra.mxu0 %v1725_v2 }
 0x216   : > { %982 = vmatpush.bf16.xpose.msra.mxu0 %v1714_v51 }
 0x21e   : > { %983 = vmatpush.bf16.xpose.msra.mxu0 %v1701_v40 }
 0x226   : > { %984 = vmatpush.bf16.xpose.msra.mxu0 %v1691_v17 }
 0x22d   : > { %985 = vmatmul.bf16.vlgmr.msra.gmra.mxu0 %v903_v25 }
 0x254   : > { %v960_v56 = vpop.f32.mrf.mxu1 }
 0x255   : > { %v961_v13 = vadd.f32 %v960_v56, %v937_v1 }
 0x257   : > { %v1206_v0 = vmul.f32 -1.442695, %v961_v13 }
 0x259   : > { %1252 = vpow2.f32 %v1206_v0 }
 0x25c   : > { %v962_v44 = vpop.f32.mrf.mxu1 }
 0x25f   : > { %v1253_v40 = vpop.eup %1252 }
 0x260   : > { %v1003_v30 = vadd.f32 1.0, %v1253_v40 }
 0x262   : > { %vm1026_vm1 = vweird.f32 %v1003_v30  ;;  %v1030_v9 = vand.u32 2147483647, %v1003_v30  ;;  %v1032_v3 = vand.u32 2147483648, %v1003_v30 }
 0x264   : > { %v947_v47 = vpop.f32.mrf.mxu0  ;;  %v1033_v52 = vor.u32 1.1754944e-38, %v1032_v3  ;;  %vm1031_vm9 = vcmp.eq.f32.partialorder %v1030_v9, 8.507059e+37 }
 0x265   : > { %v948_v21 = vadd.f32 %v947_v47, %v937_v1  ;;  %v1080_v47 = vlaneseq }
 0x267   : > { %v1205_v51 = vmul.f32 -1.442695, %v948_v21 }
 0x26c   : > { %v949_v22 = vpop.f32.mrf.mxu0 }
 0x271   : > { %v973_v42 = vpop.f32.mrf.mxu2 }
 0x272   : > { %v974_v14 = vadd.f32 %v973_v42, %v937_v1 }
 0x274   : > { %v1207_v2 = vmul.f32 -1.442695, %v974_v14 }
 0x276   : > { %1254 = vpow2.f32 %v1207_v2 }
 0x277   : > { %1256 = vpow2.f32 %v1205_v51 }
 0x278   : > { %1258 = vrcp.f32 %v1003_v30 }
 0x279   : > { %v975_v20 = vpop.f32.mrf.mxu2 }
 0x27c   : > { %v1255_v17 = vpop.eup %1254 }
 0x27d   : > { %v1257_v16 = vpop.eup %1256  ;;  %v1004_v34 = vadd.f32 1.0, %v1255_v17 }
 0x27e   : > { %v1002_v46 = vadd.f32 1.0, %v1257_v16  ;;  %v1259_v59 = vpop.eup %1258 }
 0x27f   : > { %1260 = vrcp.f32 %v1004_v34  ;;  %v1022_v15 = vmul.f32 %v1259_v59, %v1003_v30  ;;  %vm1027_vm2 = vweird.f32 %v1259_v59  ;;  %vm1041_vm3 = vweird.f32 %v1004_v34 }
 0x280   : > { %1262 = vrcp.f32 %v1002_v46  ;;  %vm1768_vm5 = vmor %vm1026_vm1, %vm1027_vm2  ;;  %v1045_v7 = vand.u32 2147483647, %v1004_v34  ;;  %v1047_v18 = vand.u32 2147483648, %v1004_v34  ;;  %vm1011_vm6 = vweird.f32 %v1002_v46 }
 0x281   : > { %v1023_v39 = vsub.f32 1.0, %v1022_v15  ;;  %v1015_v35 = vand.u32 2147483647, %v1002_v46  ;;  %v1017_v58 = vand.u32 2147483648, %v1002_v46  ;;  %vm1073_vm1 = vcmask 1040384  }
 0x282   : > { %vm1046_vm11 = vcmp.eq.f32.partialorder %v1045_v7, 8.507059e+37  ;;  %v1048_v10 = vor.u32 1.1754944e-38, %v1047_v18  ;;  %vm1075_vm2 = vcmask 1042434  }
 0x283   : > { %v1024_v60 = vmul.f32 %v1259_v59, %v1023_v39  ;;  %v1018_v33 = vor.u32 1.1754944e-38, %v1017_v58  ;;  %vm1016_vm13 = vcmp.eq.f32.partialorder %v1015_v35, 8.507059e+37 }
 0x285   : > { %v1261_v5 = vpop.eup %1260  ;;  %v1025_v29 = vadd.f32 %v1259_v59, %v1024_v60 }
 0x286   : > { %v1263_v23 = vpop.eup %1262  ;;  %v1037_v48 = vmul.f32 %v1261_v5, %v1004_v34  ;;  %vm1042_vm4 = vweird.f32 %v1261_v5 }
 0x287   : > { %v1007_v45 = vmul.f32 %v1263_v23, %v1002_v46  ;;  %vm1012_vm7 = vweird.f32 %v1263_v23  ;;  %vm1772_vm8 = vmor %vm1041_vm3, %vm1042_vm4  ;;  %v1029_v12 = vsel %vm1768_vm5, %v1259_v59, %v1025_v29  ;;  %vm1077_vm3 = vcmask 1041408  }
 0x288   : > { %v1038_v57 = vsub.f32 1.0, %v1037_v48  ;;  %vm1778_vm10 = vmor %vm1011_vm6, %vm1012_vm7  ;;  %v1034_v32 = vsel %vm1031_vm9, %v1033_v52, %v1029_v12  ;;  %vm1082_vm4 = vcmp.lt.s32.totalorder %v1080_v47, 512 }
 0x289   : > { %v1008_v61 = vsub.f32 1.0, %v1007_v45  ;;  %v1070_v42 = vrot.slane %v1034_v32, 7 }
 0x28a   : > { %v1039_v62 = vmul.f32 %v1261_v5, %v1038_v57 }
 0x28b   : > { %v1009_v4 = vmul.f32 %v1263_v23, %v1008_v61 }
 0x28c   : > { %v1040_v24 = vadd.f32 %v1261_v5, %v1039_v62 }
 0x28d   : > { %v1010_v8 = vadd.f32 %v1263_v23, %v1009_v4 }
 0x28e   : > { %v1044_v53 = vsel %vm1772_vm8, %v1261_v5, %v1040_v24 }
 0x28f   : > { %v1014_v37 = vsel %vm1778_vm10, %v1263_v23, %v1010_v8  ;;  %v1049_v41 = vsel %vm1046_vm11, %v1048_v10, %v1044_v53 }
 0x290   : > { %v1019_v44 = vsel %vm1016_vm13, %v1018_v33, %v1014_v37 }
 0x291   : > { %v1074_v14 = vsel %vm1073_vm1, %v1019_v44, %v1070_v42 }
 0x2aa   : > { %v986_v54 = vpop.f32.mrf.mxu0 }
 0x2ab   : > { %v987_v50 = vadd.f32 %v986_v54, %v937_v1  ;;  %v1071_v1 = vrot.slane %v1049_v41, 6 }
 0x2ad   : > { %v1208_v55 = vmul.f32 -1.442695, %v987_v50 }
 0x2af   : > { %1264 = vpow2.f32 %v1208_v55 }
 0x2b2   : > { %v988_v27 = vpop.f32.mrf.mxu0 }
 0x2b5   : > { %v1265_v6 = vpop.eup %1264 }
 0x2b6   : > { %v1005_v49 = vadd.f32 1.0, %v1265_v6 }
 0x2b8   : > { %1266 = vrcp.f32 %v1005_v49  ;;  %v1062_v25 = vand.u32 2147483648, %v1005_v49  ;;  %v1060_v28 = vand.u32 2147483647, %v1005_v49  ;;  %vm1056_vm14 = vweird.f32 %v1005_v49 }
 0x2ba   : > { %v1063_v56 = vor.u32 1.1754944e-38, %v1062_v25  ;;  %vm1061_vm0 = vcmp.eq.f32.partialorder %v1060_v28, 8.507059e+37 }
 0x2be   : > { %v1267_v43 = vpop.eup %1266 }
 0x2bf   : > { %v1052_v11 = vmul.f32 %v1267_v43, %v1005_v49  ;;  %vm1057_vm12 = vweird.f32 %v1267_v43 }
 0x2c0   : > { %vm1058_vm15 = vmor %vm1056_vm14, %vm1057_vm12 }
 0x2c1   : > { %v1053_v31 = vsub.f32 1.0, %v1052_v11 }
 0x2c3   : > { %v1054_v36 = vmul.f32 %v1267_v43, %v1053_v31 }
 0x2c5   : > { %v1055_v63 = vadd.f32 %v1267_v43, %v1054_v36 }
 0x2c7   : > { %v1059_v22 = vsel %vm1058_vm15, %v1267_v43, %v1055_v63 }
 0x2c8   : > { %v1064_v20 = vsel %vm1061_vm0, %v1063_v56, %v1059_v22 }
 0x2c9   : > { %v1072_v13 = vrot.slane %v1064_v20, 5 }
 0x2cb   : > { %v1076_v0 = vsel %vm1075_vm2, %v1071_v1, %v1072_v13 }
 0x2cc   : > { %v1078_v21 = vsel %vm1077_vm3, %v1074_v14, %v1076_v0 }
 0x2cd   : > { %1084 = vst.msk [vmem:[%s277_s14] sm:$0xf] %vm1082_vm4, %v1078_v21 }
 0x2ce PF: > { %s18_s26 = sadd.s32 1, %s1274_s26  }
 0x2cf   : > { %p15_p4 = scmp.ge.s32.totalorder %s18_s26, 4  }
 0x2d1   :  { %17 = sbr.rel (!%p15_p4) target bundleno = 2 (0x2), region = 78 }

</bundles_post_ra>
